<compile_context>
chip_gen: v7x
topology: tpu7x:2x2x1
jax: 0.10.0
libtpu: 0.0.40
codegen_flags: <defaults>
</compile_context>

<pallas_src>
import math
import functools

import jax
import jax.numpy as jnp
from jax.experimental import pallas as pl
from jax.experimental.pallas import tpu as pltpu

_INV_SQRT2 = 0.7071067811865475  # 1/sqrt(2), folded into the erf argument as a mul


def _round_up(n, m):
    return ((n + m - 1) // m) * m


def _ffn_kernel(x_ref, w1_ref, b1_ref, w2_ref, b2_ref, g_ref, beta_ref,
                o_ref, *, eps):
    # x_ref: (tm, H) f32; w1: (H, I); b1: (1, I); w2: (I, H); b2/gamma/beta: (1, H)
    x = x_ref[...].astype(jnp.float32)

    # dense_1: bf16 (or f32) operands on the MXU, f32 accumulation.
    h = jnp.dot(x.astype(w1_ref.dtype), w1_ref[...],
                preferred_element_type=jnp.float32) + b1_ref[...]

    # erf-GELU (matches the PyTorch module's gelu); multiply by 1/sqrt(2), no divide.
    h = h * 0.5 * (1.0 + jax.lax.erf(h * _INV_SQRT2))

    # dense_2
    y = jnp.dot(h.astype(w2_ref.dtype), w2_ref[...],
                preferred_element_type=jnp.float32) + b2_ref[...]

    # dropout is identity in eval mode (see TODO at top).

    # residual + LayerNorm over last axis (biased variance, like torch.nn.LayerNorm)
    z = y + x
    mean = jnp.mean(z, axis=-1, keepdims=True)
    var = jnp.mean((z - mean) ** 2, axis=-1, keepdims=True)
    z_hat = (z - mean) * jax.lax.rsqrt(var + eps)
    o_ref[...] = (z_hat * g_ref[...] + beta_ref[...]).astype(o_ref.dtype)


def _build_ffn_call(H, I, rows_p, tile_rows, eps, out_dtype, single_buffer_weights):
    def const_spec(shape):
        # Constant index_map -> nothing to prefetch; single-buffer to save VMEM.
        if single_buffer_weights:
            return pl.BlockSpec(shape, lambda i: (0, 0),
                                pipeline_mode=pl.Buffered(1))
        return pl.BlockSpec(shape, lambda i: (0, 0))

    grid = (rows_p // tile_rows,)
    return pl.pallas_call(
        functools.partial(_ffn_kernel, eps=eps),
        out_shape=jax.ShapeDtypeStruct((rows_p, H), out_dtype),
        grid_spec=pltpu.PrefetchScalarGridSpec(
            num_scalar_prefetch=0,
            grid=grid,
            in_specs=[
                pl.BlockSpec((tile_rows, H), lambda i: (i, 0)),  # x tile (double-buffered)
                const_spec((H, I)),                              # w1 (resident)
                const_spec((1, I)),                              # b1
                const_spec((I, H)),                              # w2 (resident)
                const_spec((1, H)),                              # b2
                const_spec((1, H)),                              # gamma
                const_spec((1, H)),                              # beta
            ],
            out_specs=pl.BlockSpec((tile_rows, H), lambda i: (i, 0)),
        ),
        compiler_params=pltpu.CompilerParams(
            dimension_semantics=("parallel",),
            vmem_limit_bytes=64 * 1024 * 1024,
        ),
    )


def feed_forward(x, w1, b1, w2, b2, gamma, beta, *, eps=1e-12,
                 tile_rows=256, use_bf16_matmul=True):
    """x: (batch, seq, hidden) float32. Returns same shape."""
    B, S, H = x.shape
    I = w1.shape[1]
    rows = B * S

    # Large row tiles feed the MXU and amortize per-step overhead; clamp to the
    # 8-aligned row count so tiny inputs don't over-pad, then pad to a multiple.
    tile_rows = max(8, min(tile_rows, _round_up(rows, 8)))
    rows_p = _round_up(rows, tile_rows)

    x2d = x.reshape(rows, H).astype(jnp.float32)
    if rows_p != rows:
        x2d = jnp.pad(x2d, ((0, rows_p - rows), (0, 0)))

    mm_dtype = jnp.bfloat16 if use_bf16_matmul else jnp.float32
    w1c = w1.astype(mm_dtype)   # pre-cast outside the hot loop
    w2c = w2.astype(mm_dtype)

    b1_2d = b1.reshape(1, I).astype(jnp.float32)
    b2_2d = b2.reshape(1, H).astype(jnp.float32)
    g_2d = gamma.reshape(1, H).astype(jnp.float32)
    beta_2d = beta.reshape(1, H).astype(jnp.float32)

    out2d = None
    for single_buf in (True, False):
        try:
            call = _build_ffn_call(H, I, rows_p, tile_rows, eps, x.dtype, single_buf)
            out2d = call(x2d, w1c, b1_2d, w2c, b2_2d, g_2d, beta_2d)
            break
        except Exception:
            # Fall back to default (double-buffered) specs if Buffered(1) is
            # unsupported by this JAX build.
            if not single_buf:
                raise

    return out2d[:rows].reshape(B, S, H)


if __name__ == "__main__":
    # module config (matches FeedForward(hidden_size, inner_size, ..., 'gelu', eps))
    hidden_size = 32
    inner_size = 64
    layer_norm_eps = 1e-12

    batch, seq = 2, 8

    key = jax.random.PRNGKey(0)
    kx, kw1, kb1, kw2, kb2 = jax.random.split(key, 5)

    x = jax.random.normal(kx, (batch, seq, hidden_size), dtype=jnp.float32)

    # deterministic synthetic parameters (xavier-ish scaling)
    w1 = jax.random.normal(kw1, (hidden_size, inner_size), jnp.float32) * (
        1.0 / math.sqrt(hidden_size))
    b1 = jax.random.normal(kb1, (inner_size,), jnp.float32) * 0.01
    w2 = jax.random.normal(kw2, (inner_size, hidden_size), jnp.float32) * (
        1.0 / math.sqrt(inner_size))
    b2 = jax.random.normal(kb2, (hidden_size,), jnp.float32) * 0.01
    gamma = jnp.ones((hidden_size,), jnp.float32)
    beta = jnp.zeros((hidden_size,), jnp.float32)

    # pure-JAX reference (f32)
    h = x @ w1 + b1
    h = h * 0.5 * (1.0 + jax.lax.erf(h * _INV_SQRT2))
    y = h @ w2 + b2
    z = y + x
    mean = jnp.mean(z, axis=-1, keepdims=True)
    var = jnp.mean((z - mean) ** 2, axis=-1, keepdims=True)
    ref = (z - mean) / jnp.sqrt(var + layer_norm_eps) * gamma + beta

    # exact path (f32 matmuls) -> tight tolerance
    out_f32 = feed_forward(x, w1, b1, w2, b2, gamma, beta,
                           eps=layer_norm_eps, use_bf16_matmul=False)
    out_f32 = jax.block_until_ready(out_f32)
    assert out_f32.shape == (batch, seq, hidden_size)
    assert jnp.allclose(out_f32, ref, atol=1e-5, rtol=1e-5), "f32 path mismatch vs reference"

    # fast path (bf16 matmul operands, f32 accumulation) -> bf16-level tolerance
    out_bf16 = feed_forward(x, w1, b1, w2, b2, gamma, beta,
                            eps=layer_norm_eps, use_bf16_matmul=True)
    out_bf16 = jax.block_until_ready(out_bf16)
    assert out_bf16.shape == (batch, seq, hidden_size)
    assert jnp.allclose(out_bf16, ref, atol=5e-2, rtol=5e-2), "bf16 path mismatch vs reference"

    print("KERNEL_OK")
</pallas_src>

<mosaic_0001>
module attributes {stable_mosaic.version = 11 : i64} {
  func.func @_ffn_kernel(%arg0: i32, %arg1: memref<16x32xf32, #tpu.memory_space<vmem>>, %arg2: memref<32x64xf32, #tpu.memory_space<vmem>>, %arg3: memref<1x64xf32, #tpu.memory_space<vmem>>, %arg4: memref<64x32xf32, #tpu.memory_space<vmem>>, %arg5: memref<1x32xf32, #tpu.memory_space<vmem>>, %arg6: memref<1x32xf32, #tpu.memory_space<vmem>>, %arg7: memref<1x32xf32, #tpu.memory_space<vmem>>, %arg8: memref<16x32xf32, #tpu.memory_space<vmem>>) attributes {dimension_semantics = [#tpu.dimension_semantics<parallel>], iteration_bounds = array<i64: 1>, scalar_prefetch = 0 : i64, scratch_operands = 0 : i64, tpu.core_type = #tpu.core_type<tc>, window_params = [{transform_indices = @transform_0, window_bounds = array<i64: 16, 32>}, {pipeline_mode = #tpu.pipeline_mode<synchronous>, transform_indices = @transform_1, window_bounds = array<i64: 32, 64>}, {pipeline_mode = #tpu.pipeline_mode<synchronous>, transform_indices = @transform_2, window_bounds = array<i64: 1, 64>}, {pipeline_mode = #tpu.pipeline_mode<synchronous>, transform_indices = @transform_3, window_bounds = array<i64: 64, 32>}, {pipeline_mode = #tpu.pipeline_mode<synchronous>, transform_indices = @transform_4, window_bounds = array<i64: 1, 32>}, {pipeline_mode = #tpu.pipeline_mode<synchronous>, transform_indices = @transform_5, window_bounds = array<i64: 1, 32>}, {pipeline_mode = #tpu.pipeline_mode<synchronous>, transform_indices = @transform_6, window_bounds = array<i64: 1, 32>}, {transform_indices = @transform_7, window_bounds = array<i64: 16, 32>}]} {
    %c0 = arith.constant 0 : index
    %c0_0 = arith.constant 0 : index
    %0 = vector.load %arg1[%c0, %c0_0] : memref<16x32xf32, #tpu.memory_space<vmem>>, vector<16x32xf32>
    %c0_1 = arith.constant 0 : index
    %c0_2 = arith.constant 0 : index
    %1 = vector.load %arg2[%c0_1, %c0_2] : memref<32x64xf32, #tpu.memory_space<vmem>>, vector<32x64xf32>
    %cst = arith.constant dense<0.000000e+00> : vector<16x64xf32>
    %2 = tpu.matmul %0, %1, %cst {dimension_numbers = #tpu.dot_dimension_numbers<[1], [0], [0], [1], [0, 0, 1, 1], [], []>} : vector<16x32xf32>, vector<32x64xf32>, vector<16x64xf32> -> vector<16x64xf32>
    %c0_3 = arith.constant 0 : index
    %c0_4 = arith.constant 0 : index
    %3 = vector.load %arg3[%c0_3, %c0_4] : memref<1x64xf32, #tpu.memory_space<vmem>>, vector<1x64xf32>
    %4 = vector.broadcast %3 : vector<1x64xf32> to vector<16x64xf32>
    %5 = arith.addf %2, %4 : vector<16x64xf32>
    %cst_5 = arith.constant 5.000000e-01 : f32
    %6 = vector.broadcast %cst_5 : f32 to vector<16x64xf32>
    %7 = arith.mulf %5, %6 : vector<16x64xf32>
    %cst_6 = arith.constant 0.707106769 : f32
    %8 = vector.broadcast %cst_6 : f32 to vector<16x64xf32>
    %9 = arith.mulf %5, %8 : vector<16x64xf32>
    %10 = math.erf %9 : vector<16x64xf32>
    %cst_7 = arith.constant 1.000000e+00 : f32
    %11 = vector.broadcast %cst_7 : f32 to vector<16x64xf32>
    %12 = arith.addf %11, %10 : vector<16x64xf32>
    %13 = arith.mulf %7, %12 : vector<16x64xf32>
    %c0_8 = arith.constant 0 : index
    %c0_9 = arith.constant 0 : index
    %14 = vector.load %arg4[%c0_8, %c0_9] : memref<64x32xf32, #tpu.memory_space<vmem>>, vector<64x32xf32>
    %cst_10 = arith.constant dense<0.000000e+00> : vector<16x32xf32>
    %15 = tpu.matmul %13, %14, %cst_10 {dimension_numbers = #tpu.dot_dimension_numbers<[1], [0], [0], [1], [0, 0, 1, 1], [], []>} : vector<16x64xf32>, vector<64x32xf32>, vector<16x32xf32> -> vector<16x32xf32>
    %c0_11 = arith.constant 0 : index
    %c0_12 = arith.constant 0 : index
    %16 = vector.load %arg5[%c0_11, %c0_12] : memref<1x32xf32, #tpu.memory_space<vmem>>, vector<1x32xf32>
    %17 = vector.broadcast %16 : vector<1x32xf32> to vector<16x32xf32>
    %18 = arith.addf %15, %17 : vector<16x32xf32>
    %19 = arith.addf %18, %0 : vector<16x32xf32>
    %cst_13 = arith.constant dense<0.000000e+00> : vector<16xf32>
    %20 = vector.multi_reduction <add>, %19, %cst_13 [1] : vector<16x32xf32> to vector<16xf32>
    %21 = vector.shape_cast %20 : vector<16xf32> to vector<16x1xf32>
    %cst_14 = arith.constant 3.200000e+01 : f32
    %22 = vector.broadcast %cst_14 : f32 to vector<16x1xf32>
    %23 = arith.divf %21, %22 : vector<16x1xf32>
    %24 = vector.broadcast %23 : vector<16x1xf32> to vector<16x32xf32>
    %25 = arith.subf %19, %24 : vector<16x32xf32>
    %26 = arith.mulf %25, %25 : vector<16x32xf32>
    %cst_15 = arith.constant dense<0.000000e+00> : vector<16xf32>
    %27 = vector.multi_reduction <add>, %26, %cst_15 [1] : vector<16x32xf32> to vector<16xf32>
    %28 = vector.shape_cast %27 : vector<16xf32> to vector<16x1xf32>
    %cst_16 = arith.constant 3.200000e+01 : f32
    %29 = vector.broadcast %cst_16 : f32 to vector<16x1xf32>
    %30 = arith.divf %28, %29 : vector<16x1xf32>
    %31 = vector.broadcast %23 : vector<16x1xf32> to vector<16x32xf32>
    %32 = arith.subf %19, %31 : vector<16x32xf32>
    %cst_17 = arith.constant 9.99999996E-13 : f32
    %33 = vector.broadcast %cst_17 : f32 to vector<16x1xf32>
    %34 = arith.addf %30, %33 : vector<16x1xf32>
    %35 = math.rsqrt %34 : vector<16x1xf32>
    %36 = vector.broadcast %35 : vector<16x1xf32> to vector<16x32xf32>
    %37 = arith.mulf %32, %36 : vector<16x32xf32>
    %c0_18 = arith.constant 0 : index
    %c0_19 = arith.constant 0 : index
    %38 = vector.load %arg6[%c0_18, %c0_19] : memref<1x32xf32, #tpu.memory_space<vmem>>, vector<1x32xf32>
    %39 = vector.broadcast %38 : vector<1x32xf32> to vector<16x32xf32>
    %40 = arith.mulf %37, %39 : vector<16x32xf32>
    %c0_20 = arith.constant 0 : index
    %c0_21 = arith.constant 0 : index
    %41 = vector.load %arg7[%c0_20, %c0_21] : memref<1x32xf32, #tpu.memory_space<vmem>>, vector<1x32xf32>
    %42 = vector.broadcast %41 : vector<1x32xf32> to vector<16x32xf32>
    %43 = arith.addf %40, %42 : vector<16x32xf32>
    %c0_22 = arith.constant 0 : index
    %c0_23 = arith.constant 0 : index
    %44 = vector.load %arg8[%c0_22, %c0_23] : memref<16x32xf32, #tpu.memory_space<vmem>>, vector<16x32xf32>
    tpu.vector_store %arg8[%c0_22, %c0_23], %43 {strides = array<i32>} : memref<16x32xf32, #tpu.memory_space<vmem>>, vector<16x32xf32>,
    return
  }
  func.func @transform_0(%arg0: i32) -> (i32, i32) {
    %c0_i32 = arith.constant 0 : i32
    %c0_i32_0 = arith.constant 0 : i32
    return %arg0, %c0_i32 : i32, i32
  }
  func.func @transform_1(%arg0: i32) -> (i32, i32) {
    %c0_i32 = arith.constant 0 : i32
    %c0_i32_0 = arith.constant 0 : i32
    %c0_i32_1 = arith.constant 0 : i32
    return %c0_i32, %c0_i32_0 : i32, i32
  }
  func.func @transform_2(%arg0: i32) -> (i32, i32) {
    %c0_i32 = arith.constant 0 : i32
    %c0_i32_0 = arith.constant 0 : i32
    %c0_i32_1 = arith.constant 0 : i32
    return %c0_i32, %c0_i32_0 : i32, i32
  }
  func.func @transform_3(%arg0: i32) -> (i32, i32) {
    %c0_i32 = arith.constant 0 : i32
    %c0_i32_0 = arith.constant 0 : i32
    %c0_i32_1 = arith.constant 0 : i32
    return %c0_i32, %c0_i32_0 : i32, i32
  }
  func.func @transform_4(%arg0: i32) -> (i32, i32) {
    %c0_i32 = arith.constant 0 : i32
    %c0_i32_0 = arith.constant 0 : i32
    %c0_i32_1 = arith.constant 0 : i32
    return %c0_i32, %c0_i32_0 : i32, i32
  }
  func.func @transform_5(%arg0: i32) -> (i32, i32) {
    %c0_i32 = arith.constant 0 : i32
    %c0_i32_0 = arith.constant 0 : i32
    %c0_i32_1 = arith.constant 0 : i32
    return %c0_i32, %c0_i32_0 : i32, i32
  }
  func.func @transform_6(%arg0: i32) -> (i32, i32) {
    %c0_i32 = arith.constant 0 : i32
    %c0_i32_0 = arith.constant 0 : i32
    %c0_i32_1 = arith.constant 0 : i32
    return %c0_i32, %c0_i32_0 : i32, i32
  }
  func.func @transform_7(%arg0: i32) -> (i32, i32) {
    %c0_i32 = arith.constant 0 : i32
    %c0_i32_0 = arith.constant 0 : i32
    return %arg0, %c0_i32 : i32, i32
  }
}

module attributes {stable_mosaic.version = 11 : i64} {
  func.func @_ffn_kernel(%arg0: i32, %arg1: memref<16x32xf32, #tpu.memory_space<vmem>>, %arg2: memref<32x64xf32, #tpu.memory_space<vmem>>, %arg3: memref<1x64xf32, #tpu.memory_space<vmem>>, %arg4: memref<64x32xf32, #tpu.memory_space<vmem>>, %arg5: memref<1x32xf32, #tpu.memory_space<vmem>>, %arg6: memref<1x32xf32, #tpu.memory_space<vmem>>, %arg7: memref<1x32xf32, #tpu.memory_space<vmem>>, %arg8: memref<16x32xf32, #tpu.memory_space<vmem>>) attributes {dimension_semantics = [#tpu.dimension_semantics<parallel>], iteration_bounds = array<i64: 1>, scalar_prefetch = 0 : i64, scratch_operands = 0 : i64, tpu.core_type = #tpu.core_type<tc>, window_params = [{transform_indices = @transform_0, window_bounds = array<i64: 16, 32>}, {pipeline_mode = #tpu.pipeline_mode<synchronous>, transform_indices = @transform_1, window_bounds = array<i64: 32, 64>}, {pipeline_mode = #tpu.pipeline_mode<synchronous>, transform_indices = @transform_2, window_bounds = array<i64: 1, 64>}, {pipeline_mode = #tpu.pipeline_mode<synchronous>, transform_indices = @transform_3, window_bounds = array<i64: 64, 32>}, {pipeline_mode = #tpu.pipeline_mode<synchronous>, transform_indices = @transform_4, window_bounds = array<i64: 1, 32>}, {pipeline_mode = #tpu.pipeline_mode<synchronous>, transform_indices = @transform_5, window_bounds = array<i64: 1, 32>}, {pipeline_mode = #tpu.pipeline_mode<synchronous>, transform_indices = @transform_6, window_bounds = array<i64: 1, 32>}, {transform_indices = @transform_7, window_bounds = array<i64: 16, 32>}]} {
    %c0 = arith.constant 0 : index
    %c0_0 = arith.constant 0 : index
    %0 = vector.load %arg1[%c0, %c0_0] : memref<16x32xf32, #tpu.memory_space<vmem>>, vector<16x32xf32>
    %c0_1 = arith.constant 0 : index
    %c0_2 = arith.constant 0 : index
    %1 = vector.load %arg2[%c0_1, %c0_2] : memref<32x64xf32, #tpu.memory_space<vmem>>, vector<32x64xf32>
    %cst = arith.constant dense<0.000000e+00> : vector<16x64xf32>
    %2 = tpu.matmul %0, %1, %cst {dimension_numbers = #tpu.dot_dimension_numbers<[1], [0], [0], [1], [0, 0, 1, 1], [], []>} : vector<16x32xf32>, vector<32x64xf32>, vector<16x64xf32> -> vector<16x64xf32>
    %c0_3 = arith.constant 0 : index
    %c0_4 = arith.constant 0 : index
    %3 = vector.load %arg3[%c0_3, %c0_4] : memref<1x64xf32, #tpu.memory_space<vmem>>, vector<1x64xf32>
    %4 = vector.broadcast %3 : vector<1x64xf32> to vector<16x64xf32>
    %5 = arith.addf %2, %4 : vector<16x64xf32>
    %cst_5 = arith.constant 5.000000e-01 : f32
    %6 = vector.broadcast %cst_5 : f32 to vector<16x64xf32>
    %7 = arith.mulf %5, %6 : vector<16x64xf32>
    %cst_6 = arith.constant 0.707106769 : f32
    %8 = vector.broadcast %cst_6 : f32 to vector<16x64xf32>
    %9 = arith.mulf %5, %8 : vector<16x64xf32>
    %10 = math.erf %9 : vector<16x64xf32>
    %cst_7 = arith.constant 1.000000e+00 : f32
    %11 = vector.broadcast %cst_7 : f32 to vector<16x64xf32>
    %12 = arith.addf %11, %10 : vector<16x64xf32>
    %13 = arith.mulf %7, %12 : vector<16x64xf32>
    %c0_8 = arith.constant 0 : index
    %c0_9 = arith.constant 0 : index
    %14 = vector.load %arg4[%c0_8, %c0_9] : memref<64x32xf32, #tpu.memory_space<vmem>>, vector<64x32xf32>
    %cst_10 = arith.constant dense<0.000000e+00> : vector<16x32xf32>
    %15 = tpu.matmul %13, %14, %cst_10 {dimension_numbers = #tpu.dot_dimension_numbers<[1], [0], [0], [1], [0, 0, 1, 1], [], []>} : vector<16x64xf32>, vector<64x32xf32>, vector<16x32xf32> -> vector<16x32xf32>
    %c0_11 = arith.constant 0 : index
    %c0_12 = arith.constant 0 : index
    %16 = vector.load %arg5[%c0_11, %c0_12] : memref<1x32xf32, #tpu.memory_space<vmem>>, vector<1x32xf32>
    %17 = vector.broadcast %16 : vector<1x32xf32> to vector<16x32xf32>
    %18 = arith.addf %15, %17 : vector<16x32xf32>
    %19 = arith.addf %18, %0 : vector<16x32xf32>
    %cst_13 = arith.constant dense<0.000000e+00> : vector<16xf32>
    %20 = vector.multi_reduction <add>, %19, %cst_13 [1] : vector<16x32xf32> to vector<16xf32>
    %21 = vector.shape_cast %20 : vector<16xf32> to vector<16x1xf32>
    %cst_14 = arith.constant 3.200000e+01 : f32
    %22 = vector.broadcast %cst_14 : f32 to vector<16x1xf32>
    %23 = arith.divf %21, %22 : vector<16x1xf32>
    %24 = vector.broadcast %23 : vector<16x1xf32> to vector<16x32xf32>
    %25 = arith.subf %19, %24 : vector<16x32xf32>
    %26 = arith.mulf %25, %25 : vector<16x32xf32>
    %cst_15 = arith.constant dense<0.000000e+00> : vector<16xf32>
    %27 = vector.multi_reduction <add>, %26, %cst_15 [1] : vector<16x32xf32> to vector<16xf32>
    %28 = vector.shape_cast %27 : vector<16xf32> to vector<16x1xf32>
    %cst_16 = arith.constant 3.200000e+01 : f32
    %29 = vector.broadcast %cst_16 : f32 to vector<16x1xf32>
    %30 = arith.divf %28, %29 : vector<16x1xf32>
    %31 = vector.broadcast %23 : vector<16x1xf32> to vector<16x32xf32>
    %32 = arith.subf %19, %31 : vector<16x32xf32>
    %cst_17 = arith.constant 9.99999996E-13 : f32
    %33 = vector.broadcast %cst_17 : f32 to vector<16x1xf32>
    %34 = arith.addf %30, %33 : vector<16x1xf32>
    %35 = math.rsqrt %34 : vector<16x1xf32>
    %36 = vector.broadcast %35 : vector<16x1xf32> to vector<16x32xf32>
    %37 = arith.mulf %32, %36 : vector<16x32xf32>
    %c0_18 = arith.constant 0 : index
    %c0_19 = arith.constant 0 : index
    %38 = vector.load %arg6[%c0_18, %c0_19] : memref<1x32xf32, #tpu.memory_space<vmem>>, vector<1x32xf32>
    %39 = vector.broadcast %38 : vector<1x32xf32> to vector<16x32xf32>
    %40 = arith.mulf %37, %39 : vector<16x32xf32>
    %c0_20 = arith.constant 0 : index
    %c0_21 = arith.constant 0 : index
    %41 = vector.load %arg7[%c0_20, %c0_21] : memref<1x32xf32, #tpu.memory_space<vmem>>, vector<1x32xf32>
    %42 = vector.broadcast %41 : vector<1x32xf32> to vector<16x32xf32>
    %43 = arith.addf %40, %42 : vector<16x32xf32>
    %c0_22 = arith.constant 0 : index
    %c0_23 = arith.constant 0 : index
    %44 = vector.load %arg8[%c0_22, %c0_23] : memref<16x32xf32, #tpu.memory_space<vmem>>, vector<16x32xf32>
    tpu.vector_store %arg8[%c0_22, %c0_23], %43 {strides = array<i32>} : memref<16x32xf32, #tpu.memory_space<vmem>>, vector<16x32xf32>,
    return
  }
  func.func @transform_0(%arg0: i32) -> (i32, i32) {
    %c0_i32 = arith.constant 0 : i32
    %c0_i32_0 = arith.constant 0 : i32
    return %arg0, %c0_i32 : i32, i32
  }
  func.func @transform_1(%arg0: i32) -> (i32, i32) {
    %c0_i32 = arith.constant 0 : i32
    %c0_i32_0 = arith.constant 0 : i32
    %c0_i32_1 = arith.constant 0 : i32
    return %c0_i32, %c0_i32_0 : i32, i32
  }
  func.func @transform_2(%arg0: i32) -> (i32, i32) {
    %c0_i32 = arith.constant 0 : i32
    %c0_i32_0 = arith.constant 0 : i32
    %c0_i32_1 = arith.constant 0 : i32
    return %c0_i32, %c0_i32_0 : i32, i32
  }
  func.func @transform_3(%arg0: i32) -> (i32, i32) {
    %c0_i32 = arith.constant 0 : i32
    %c0_i32_0 = arith.constant 0 : i32
    %c0_i32_1 = arith.constant 0 : i32
    return %c0_i32, %c0_i32_0 : i32, i32
  }
  func.func @transform_4(%arg0: i32) -> (i32, i32) {
    %c0_i32 = arith.constant 0 : i32
    %c0_i32_0 = arith.constant 0 : i32
    %c0_i32_1 = arith.constant 0 : i32
    return %c0_i32, %c0_i32_0 : i32, i32
  }
  func.func @transform_5(%arg0: i32) -> (i32, i32) {
    %c0_i32 = arith.constant 0 : i32
    %c0_i32_0 = arith.constant 0 : i32
    %c0_i32_1 = arith.constant 0 : i32
    return %c0_i32, %c0_i32_0 : i32, i32
  }
  func.func @transform_6(%arg0: i32) -> (i32, i32) {
    %c0_i32 = arith.constant 0 : i32
    %c0_i32_0 = arith.constant 0 : i32
    %c0_i32_1 = arith.constant 0 : i32
    return %c0_i32, %c0_i32_0 : i32, i32
  }
  func.func @transform_7(%arg0: i32) -> (i32, i32) {
    %c0_i32 = arith.constant 0 : i32
    %c0_i32_0 = arith.constant 0 : i32
    return %arg0, %c0_i32 : i32, i32
  }
}

</mosaic_0001>

<bundles_post_ra>
// kernel: tpu_custom_call.1
= control target key start
LH: loop header
LB: loop body
LE: loop exit
PB: predicated region body
PF: predicated region fallthrough
CT: control target
= control target key end

     0   :  { %12 = vsyncpa [#allocation3], 0  ;;  %s847_s0 = inlined_call_operand.hbm [shape: f32[16,32], index: 0, kind: input, shape index: {}]   ;;  %s848_s1 = inlined_call_operand.hbm [shape: f32[32,64], index: 1, kind: input, shape index: {}]   ;;  %s849_s2 = inlined_call_operand.hbm [shape: f32[1,64], index: 2, kind: input, shape index: {}]   ;;  %s850_s3 = inlined_call_operand.hbm [shape: f32[64,32], index: 3, kind: input, shape index: {}]   ;;  %s851_s4 = inlined_call_operand.hbm [shape: f32[1,32], index: 4, kind: input, shape index: {}]   ;;  %s852_s5 = inlined_call_operand.hbm [shape: f32[1,32], index: 5, kind: input, shape index: {}]   ;;  %s853_s6 = inlined_call_operand.hbm [shape: f32[1,32], index: 6, kind: input, shape index: {}]   ;;  %s854_s7 = inlined_call_operand.hbm [shape: f32[16,32], index: 7, kind: output, shape index: {}]  }
   0x1   :  { %13 = vsyncpa [#allocation6], 0 }
   0x2   :  { %14 = vsyncpa [#allocation9], 0 }
   0x3   :  { %15 = vsyncpa [#allocation12], 0 }
   0x4   :  { %16 = vsyncpa [#allocation4], 0  ;;  %s667_s24 = smov [#allocation5]   ;;  %s668_s26 = smov [#allocation8]  }
   0x5   :  { %s34_s25 = sshll.u32 %s667_s24, 4  ;;  %s56_s27 = sshll.u32 %s668_s26, 4  ;;  %s35_s25 = int_to_ptr.vmem [resolvable:$true] %s34_s25  ;;  %s717_s27 = int_to_ptr.vmem [resolvable:$true] %s56_s27 }
   0x6   :  { %s481_s30 = scalar_lea.hbm %s848_s1, 512 }
   0x7   :  { %p482_p0 = scmp.ne.s32.totalorder %s848_s1, %s481_s30  ;;  %p485_p1 = scmp.lt.u32.totalorder %s481_s30, %s848_s1 }
   0x9   :  { %p487_p2 = pnand %p485_p1, %p482_p0 }
   0xb   :  { %490 = shalt.err (!%p487_p2)
}
   0xc   :  { %s491_s12 = scalar_lea.vmem %s35_s25, 512  ;;  %p496_p4 = scmp.lt.s32.totalorder %s35_s25, %s35_s25 }
   0xd   :  { %p492_p3 = scmp.ne.s32.totalorder %s35_s25, %s491_s12  ;;  %p497_p5 = scmp.lt.s32.totalorder %s491_s12, %s491_s12 }
   0xf   :  { %p498_p6 = por %p497_p5, %p496_p4 }
  0x11   :  { %p499_p7 = pnand %p498_p6, %p492_p3 }
  0x13   :  { %502 = shalt.err (!%p499_p7)
}
  0x14   :  { %s669_s13 = smov 128   ;;  %s670_s14 = smov 8  }
  0x15   :  { %40 = dma.hbm_to_vmem [thread:$0]  %s848_s1, 512, %s35_s25, [#allocation6], %s669_s13, %s669_s13, %s670_s14  }
  0x16   :  { %s503_s19 = scalar_lea.hbm %s850_s3, 1024 }
  0x17   :  { %p504_p8 = scmp.ne.s32.totalorder %s850_s3, %s503_s19  ;;  %p507_p9 = scmp.lt.u32.totalorder %s503_s19, %s850_s3 }
  0x19   :  { %p509_p10 = pnand %p507_p9, %p504_p8 }
  0x1b   :  { %512 = shalt.err (!%p509_p10)
}
  0x1c   :  { %s513_s24 = scalar_lea.vmem %s717_s27, 1024  ;;  %p518_p12 = scmp.lt.s32.totalorder %s717_s27, %s717_s27 }
  0x1d   :  { %p514_p11 = scmp.ne.s32.totalorder %s717_s27, %s513_s24  ;;  %p519_p13 = scmp.lt.s32.totalorder %s513_s24, %s513_s24 }
  0x1f   :  { %p520_p0 = por %p519_p13, %p518_p12 }
  0x21   :  { %p521_p1 = pnand %p520_p0, %p514_p11 }
  0x23   :  { %524 = shalt.err (!%p521_p1)
}
  0x24   :  { %62 = dma.hbm_to_vmem [thread:$0]  %s850_s3, 1024, %s717_s27, [#allocation9], %s669_s13, %s669_s13, %s670_s14  }
  0x25   :  { %s671_s26 = smov [#allocation11]   ;;  %s672_s29 = smov [#allocation2]  }
  0x26   :  { %s79_s28 = sshll.u32 %s671_s26, 4  ;;  %s22_s30 = sshll.u32 %s672_s29, 4  ;;  %s80_s28 = int_to_ptr.vmem [resolvable:$true] %s79_s28  ;;  %s754_s30 = int_to_ptr.vmem [resolvable:$true] %s22_s30 }
  0x27   :  { %s525_s10 = scalar_lea.hbm %s852_s5, 16 }
  0x28   :  { %p526_p2 = scmp.ne.s32.totalorder %s852_s5, %s525_s10  ;;  %p529_p3 = scmp.lt.u32.totalorder %s525_s10, %s852_s5 }
  0x2a   :  { %p531_p4 = pnand %p529_p3, %p526_p2 }
  0x2c   :  { %534 = shalt.err (!%p531_p4)
}
  0x2d   :  { %s535_s3 = scalar_lea.vmem %s80_s28, 16  ;;  %s539_s27 = scalar_lea.vmem %s80_s28, 32 }
  0x2e   :  { %p536_p5 = scmp.ne.s32.totalorder %s80_s28, %s535_s3  ;;  %p540_p6 = scmp.lt.s32.totalorder %s80_s28, %s80_s28 }
  0x2f   :  { %p541_p7 = scmp.lt.s32.totalorder %s539_s27, %s535_s3 }
  0x31   :  { %p542_p8 = por %p541_p7, %p540_p6 }
  0x33   :  { %p543_p9 = pnand %p542_p8, %p536_p5 }
  0x35   :  { %546 = shalt.err (!%p543_p9)
}
  0x36   :  { %82 = dma.hbm_to_vmem [thread:$0]  %s852_s5, 16, %s80_s28, [#allocation12]  }
  0x37   :  { %s547_s21 = scalar_lea.hbm %s847_s0, 256 }
  0x38   :  { %p548_p10 = scmp.ne.s32.totalorder %s847_s0, %s547_s21  ;;  %p551_p11 = scmp.lt.u32.totalorder %s547_s21, %s847_s0 }
  0x3a   :  { %p553_p12 = pnand %p551_p11, %p548_p10 }
  0x3c   :  { %556 = shalt.err (!%p553_p12)
}
  0x3d   :  { %s557_s25 = scalar_lea.vmem %s754_s30, 256  ;;  %p562_p0 = scmp.lt.s32.totalorder %s754_s30, %s754_s30 }
  0x3e   :  { %p558_p13 = scmp.ne.s32.totalorder %s754_s30, %s557_s25  ;;  %p563_p1 = scmp.lt.s32.totalorder %s557_s25, %s557_s25 }
  0x40   :  { %p564_p2 = por %p563_p1, %p562_p0 }
  0x42   :  { %p565_p3 = pnand %p564_p2, %p558_p13 }
  0x44   :  { %568 = shalt.err (!%p565_p3)
}
  0x45   :  { %28 = dma.hbm_to_vmem [thread:$0]  %s847_s0, 256, %s754_s30, [#allocation3], %s669_s13, %s669_s13, %s670_s14  }
  0x46   :  { %s673_s28 = smov [#allocation7]   ;;  %s674_s8 = smov [#allocation10]  }
  0x47   :  { %s47_s29 = sshll.u32 %s673_s28, 4  ;;  %s69_s9 = sshll.u32 %s674_s8, 4  ;;  %s48_s29 = int_to_ptr.vmem [resolvable:$true] %s47_s29  ;;  %s70_s9 = int_to_ptr.vmem [resolvable:$true] %s69_s9 }
  0x48   :  { %s569_s12 = scalar_lea.hbm %s849_s2, 16 }
  0x49   :  { %p570_p4 = scmp.ne.s32.totalorder %s849_s2, %s569_s12  ;;  %p573_p5 = scmp.lt.u32.totalorder %s569_s12, %s849_s2 }
  0x4b   :  { %p575_p6 = pnand %p573_p5, %p570_p4 }
  0x4d   :  { %578 = shalt.err (!%p575_p6)
}
  0x4e   :  { %s579_s0 = scalar_lea.vmem %s48_s29, 16  ;;  %s583_s30 = scalar_lea.vmem %s48_s29, 32 }
  0x4f   :  { %p580_p7 = scmp.ne.s32.totalorder %s48_s29, %s579_s0  ;;  %p584_p8 = scmp.lt.s32.totalorder %s48_s29, %s48_s29 }
  0x50   :  { %p585_p9 = scmp.lt.s32.totalorder %s583_s30, %s579_s0 }
  0x52   :  { %p586_p10 = por %p585_p9, %p584_p8 }
  0x54   :  { %p587_p11 = pnand %p586_p10, %p580_p7 }
  0x56   :  { %590 = shalt.err (!%p587_p11)
}
  0x57   :  { %50 = dma.hbm_to_vmem [thread:$0]  %s849_s2, 16, %s48_s29, [#allocation6]  }
  0x58   :  { %s591_s21 = scalar_lea.hbm %s851_s4, 16 }
  0x59   :  { %p592_p12 = scmp.ne.s32.totalorder %s851_s4, %s591_s21  ;;  %p595_p13 = scmp.lt.u32.totalorder %s591_s21, %s851_s4 }
  0x5b   :  { %p597_p0 = pnand %p595_p13, %p592_p12 }
  0x5d   :  { %600 = shalt.err (!%p597_p0)
}
  0x5e   :  { %s601_s25 = scalar_lea.vmem %s70_s9, 16  ;;  %s605_s5 = scalar_lea.vmem %s70_s9, 32 }
  0x5f   :  { %p602_p1 = scmp.ne.s32.totalorder %s70_s9, %s601_s25  ;;  %p606_p2 = scmp.lt.s32.totalorder %s70_s9, %s70_s9 }
  0x60   :  { %p607_p3 = scmp.lt.s32.totalorder %s605_s5, %s601_s25 }
  0x62   :  { %p608_p4 = por %p607_p3, %p606_p2 }
  0x64   :  { %p609_p5 = pnand %p608_p4, %p602_p1 }
  0x66   :  { %612 = shalt.err (!%p609_p5)
}
  0x67   :  { %72 = dma.hbm_to_vmem [thread:$0]  %s851_s4, 16, %s70_s9, [#allocation9]  }
  0x68   :  { %s675_s28 = smov [#allocation13]   ;;  %s613_s11 = scalar_lea.hbm %s853_s6, 16 }
  0x69   :  { %s89_s29 = sshll.u32 %s675_s28, 4  ;;  %p614_p6 = scmp.ne.s32.totalorder %s853_s6, %s613_s11  ;;  %s90_s29 = int_to_ptr.vmem [resolvable:$true] %s89_s29 }
  0x6a   :  { %p617_p7 = scmp.lt.u32.totalorder %s613_s11, %s853_s6 }
  0x6c   :  { %p619_p8 = pnand %p617_p7, %p614_p6 }
  0x6e   :  { %622 = shalt.err (!%p619_p8)
}
  0x6f   :  { %s623_s27 = scalar_lea.vmem %s90_s29, 16  ;;  %s627_s4 = scalar_lea.vmem %s90_s29, 32 }
  0x70   :  { %p624_p9 = scmp.ne.s32.totalorder %s90_s29, %s623_s27  ;;  %p628_p10 = scmp.lt.s32.totalorder %s90_s29, %s90_s29 }
  0x71   :  { %p629_p11 = scmp.lt.s32.totalorder %s627_s4, %s623_s27 }
  0x73   :  { %p630_p12 = por %p629_p11, %p628_p10 }
  0x75   :  { %p631_p13 = pnand %p630_p12, %p624_p9 }
  0x77   :  { %634 = shalt.err (!%p631_p13)
}
  0x78   :  { %92 = dma.hbm_to_vmem [thread:$0]  %s853_s6, 16, %s90_s29, [#allocation12]  }
  0x79   :  { %657 = dma.done.wait [#allocation3], 256  }
  0x7a   :  { %658 = vsyncadd [#allocation3], 4294967040 }
  0x7b   :  { %659 = dma.done.wait [#allocation6], 528  }
  0x7c   :  { %660 = vsyncadd [#allocation6], 4294966768 }
  0x7d   :  { %661 = dma.done.wait [#allocation9], 1040  }
  0x7e   :  { %662 = vsyncadd [#allocation9], 4294966256 }
  0x7f   :  { %663 = dma.done.wait [#allocation12], 32  }
  0x80   :  { %664 = vsyncadd [#allocation12], 4294967264  ;;  %vm127_vm0 = vcmask 261120   ;;  %v116_v0 = vld [vmem:[#allocation5] sm:$0xff]  ;;  %v117_v1 = vld [vmem:[#allocation5 + $0x8] sm:$0xff]  ;;  %vm234_vm1 = vcmask 523264  }
  0x81   :  { %v118_v2 = vld [vmem:[#allocation5 + $0x10] sm:$0xff]  ;;  %v439_v3 = vpack.c.bf16 %v117_v1, %v116_v0  ;;  %v119_v4 = vld [vmem:[#allocation5 + $0x18] sm:$0xff]  ;;  %v219_v8 = vld [vmem:[#allocation8] sm:$0xff]  ;;  %s676_s6 = smov [#allocation14]  }
  0x82   :  { %v114_v5 = vld [vmem:[#allocation2] sm:$0xff]  ;;  %v443_v6 = vpack.c.bf16 %v119_v4, %v118_v2  ;;  %v115_v7 = vld [vmem:[#allocation2 + $0x8] sm:$0xff]  ;;  %v223_v14 = vld [vmem:[#allocation8 + $0x20] sm:$0xff]  ;;  %s370_s30 = sshll.u32 %s676_s6, 4  ;;  %s371_s30 = int_to_ptr.vmem [resolvable:$true] %s370_s30 }
  0x83   :  { %417 = vmatprep.mubr.msk.f32.mxu0 %vm127_vm0, %v114_v5  ;;  %440 = vmatprep.subr.bf16.mxu0 %v439_v3  ;;  %v220_v9 = vld [vmem:[#allocation8 + $0x8] sm:$0xff]  ;;  %v221_v11 = vld [vmem:[#allocation8 + $0x10] sm:$0xff]  ;;  %v222_v12 = vld [vmem:[#allocation8 + $0x18] sm:$0xff]  ;;  %s635_s17 = scalar_lea.vmem %s371_s30, 256  ;;  %p640_p1 = scmp.lt.s32.totalorder %s371_s30, %s371_s30 }
  0x84   :  { %442 = vmatpush3.bf16.msra.mxu0 %v439_v3  ;;  %v447_v10 = vpack.c.bf16 %v220_v9, %v219_v8  ;;  %v451_v13 = vpack.c.bf16 %v222_v12, %v221_v11  ;;  %v224_v15 = vld [vmem:[#allocation8 + $0x28] sm:$0xff]  ;;  %v225_v17 = vld [vmem:[#allocation8 + $0x30] sm:$0xff]  ;;  %v226_v18 = vld [vmem:[#allocation8 + $0x38] sm:$0xff]  ;;  %p636_p0 = scmp.ne.s32.totalorder %s371_s30, %s635_s17  ;;  %p641_p2 = scmp.lt.s32.totalorder %s635_s17, %s635_s17 }
  0x85   :  { %444 = vmatprep.subr.bf16.mxu0 %v443_v6  ;;  %v455_v16 = vpack.c.bf16 %v224_v15, %v223_v14  ;;  %v459_v19 = vpack.c.bf16 %v226_v18, %v225_v17  ;;  %v385_v20 = vld [vmem:[#allocation7] ss:$0 sm:$0xff]  ;;  %v388_v35 = vld [vmem:[#allocation10] ss:$0 sm:$0xff]  ;;  %v391_v61 = vld [vmem:[#allocation11] ss:$0 sm:$0xff] }
  0x86   :  { %448 = vmatprep.subr.bf16.mxu1 %v447_v10  ;;  %v392_v63 = vld [vmem:[#allocation13] ss:$0 sm:$0xff]  ;;  %p642_p3 = por %p641_p2, %p640_p1 }
  0x87   :  { %450 = vmatpush3.bf16.msra.mxu1 %v447_v10 }
  0x88   :  { %446 = vmatpush3.bf16.msra.mxu0 %v443_v6  ;;  %452 = vmatprep.subr.bf16.mxu1 %v451_v13  ;;  %p643_p4 = pnand %p642_p3, %p636_p0 }
  0x8b   :  { %418 = vmatmul.mubr.msk.f32.vlgmr.msra.gmra.mrb[0].mxu0 %vm127_vm0, %v115_v7  ;;  %454 = vmatpush3.bf16.msra.mxu1 %v451_v13 }
  0x8c   :  { %456 = vmatprep.subr.bf16.mxu1 %v455_v16 }
  0x8f   :  { %458 = vmatpush3.bf16.msra.mxu1 %v455_v16 }
  0x90   :  { %460 = vmatprep.subr.bf16.mxu1 %v459_v19 }
  0x93   :  { %462 = vmatpush3.bf16.msra.mxu1 %v459_v19 }
 0x15e   :  { %v419_v21 = vpop.f32.mrb[0].mxu0 }
 0x15f   :  { %v206_v22 = vadd.f32 %v419_v21, %v385_v20  ;;  %v200_v23 = vpop.f32.mrb[1].mxu0 }
 0x160   :  { %v201_v24 = vadd.f32 %v385_v20, %v200_v23 }
 0x161   :  { %v212_v25 = vmul.f32 0.70710677, %v206_v22  ;;  %v210_v32 = vmul.f32 0.5, %v206_v22 }
 0x162   :  { %v211_v26 = vmul.f32 0.70710677, %v201_v24  ;;  %v209_v30 = vmul.f32 0.5, %v201_v24 }
 0x163   :  { %473 = verf.f32 %v212_v25 }
 0x164   :  { %475 = verf.f32 %v211_v26 }
 0x16d   :  { %v474_v27 = vpop.eup %473 }
 0x16e   :  { %v476_v28 = vpop.eup %475  ;;  %v216_v29 = vadd.f32 1.0, %v474_v27 }
 0x16f   :  { %v215_v31 = vadd.f32 1.0, %v476_v28 }
 0x170   :  { %v218_v34 = vmul.f32 %v216_v29, %v210_v32 }
 0x171   :  { %v217_v33 = vmul.f32 %v215_v31, %v209_v30 }
 0x173   :  { %436 = vmatprep.mubr.msk.f32.mxu1 %vm234_vm1, %v217_v33 }
 0x174   :  { %437 = vmatmul.mubr.msk.f32.vlgmr.msra.gmra.mrb[0].mxu1 %vm234_vm1, %v218_v34 }
 0x247   :  { %v438_v36 = vpop.f32.mrb[0].mxu1 }
 0x248   :  { %v307_v37 = vpop.f32.mrb[1].mxu1  ;;  %v313_v38 = vadd.f32 %v438_v36, %v388_v35 }
 0x249   :  { %v308_v39 = vadd.f32 %v388_v35, %v307_v37 }
 0x24a   :  { %v317_v42 = vadd.f32 %v313_v38, %v115_v7 }
 0x24b   :  { %v316_v40 = vadd.f32 %v308_v39, %v114_v5 }
 0x24c   :  { %v321_v43 = vsel %vm127_vm0, %v317_v42, 0.0 }
 0x24d   :  { %v318_v41 = vsel %vm127_vm0, %v316_v40, 0.0 }
 0x24e   :  { %319 = vadd.xlane.f32.xlu0 %v318_v41 }
 0x252   :  { %322 = vadd.xlane.f32.xlu0 %v321_v43 }
 0x2db   :  { %v320_v44 = vpop.xlane.xlu0 %319 }
 0x2dc   :  { %v325_v45 = vmul.f32 0.03125, %v320_v44 }
 0x2de   :  { %v327_v46 = vsub.f32 %v316_v40, %v325_v45 }
 0x2df   :  { %v323_v47 = vpop.xlane.xlu0 %322 }
 0x2e0   :  { %v326_v48 = vmul.f32 0.03125, %v323_v47  ;;  %v329_v49 = vmul.f32 %v327_v46, %v327_v46 }
 0x2e2   :  { %v328_v50 = vsub.f32 %v317_v42, %v326_v48  ;;  %v331_v51 = vsel %vm127_vm0, %v329_v49, 0.0 }
 0x2e3   :  { %332 = vadd.xlane.f32.xlu1 %v331_v51 }
 0x2e4   :  { %v330_v52 = vmul.f32 %v328_v50, %v328_v50 }
 0x2e6   :  { %v334_v53 = vsel %vm127_vm0, %v330_v52, 0.0 }
 0x2e7   :  { %335 = vadd.xlane.f32.xlu1 %v334_v53 }
 0x370   :  { %v333_v54 = vpop.xlane.xlu1 %332 }
 0x371   :  { %v337_v55 = vmul.f32 0.03125, %v333_v54 }
 0x373   :  { %v339_v56 = vadd.f32 1e-12, %v337_v55 }
 0x374   :  { %v336_v57 = vpop.xlane.xlu1 %335 }
 0x375   :  { %477 = vrsqrt.f32 %v339_v56  ;;  %v338_v58 = vmul.f32 0.03125, %v336_v57 }
 0x377   :  { %v340_v59 = vadd.f32 1e-12, %v338_v58 }
 0x379   :  { %479 = vrsqrt.f32 %v340_v59 }
 0x37f   :  { %v478_v60 = vpop.eup %477 }
 0x380   :  { %v343_v62 = vmul.f32 %v478_v60, %v327_v46 }
 0x382   :  { %v352_v0 = vmul.f32 %v391_v61, %v343_v62 }
 0x383   :  { %v480_v1 = vpop.eup %479 }
 0x384   :  { %v344_v2 = vmul.f32 %v480_v1, %v328_v50  ;;  %v361_v3 = vadd.f32 %v392_v63, %v352_v0 }
 0x386   :  { %v353_v4 = vmul.f32 %v391_v61, %v344_v2  ;;  %363 = vst.msk [vmem:[#allocation14] sm:$0xff] %vm127_vm0, %v361_v3 }
 0x388   :  { %v362_v5 = vadd.f32 %v392_v63, %v353_v4 }
 0x38a   :  { %364 = vst.msk [vmem:[#allocation14 + $0x8] sm:$0xff] %vm127_vm0, %v362_v5 }
 0x38b   :  { %646 = shalt.err (!%p643_p4)
}
 0x38c   :  { %s647_s20 = scalar_lea.hbm %s854_s7, 256 }
 0x38d   :  { %p648_p5 = scmp.ne.s32.totalorder %s854_s7, %s647_s20  ;;  %p651_p6 = scmp.lt.u32.totalorder %s647_s20, %s854_s7 }
 0x38f   :  { %p653_p7 = pnand %p651_p6, %p648_p5 }
 0x391   :  { %656 = shalt.err (!%p653_p7)
}
 0x392   :  { %376 = dma.vmem_to_hbm [thread:$0]  %s371_s30, 256, %s854_s7, [#allocation4], %s669_s13, %s669_s13, %s670_s14  }
 0x393   :  { %665 = dma.done.wait [#allocation4], 256  }
 0x394   :  { %666 = vsyncadd [#allocation4], 4294967040 }
 0x395   :  { %380 = vsyncpa [#allocation3], 1 }
 0x396   :  { %381 = vsyncpa [#allocation6], 1 }
 0x397   :  { %382 = vsyncpa [#allocation9], 1 }
 0x398   :  { %383 = vsyncpa [#allocation12], 1 }
 0x399   :  { %384 = vsyncpa [#allocation4], 1 }

// kernel: tpu_custom_call.1
= control target key start
LH: loop header
LB: loop body
LE: loop exit
PB: predicated region body
PF: predicated region fallthrough
CT: control target
= control target key end

     0   :  { %12 = vsyncpa [#allocation3], 0  ;;  %s847_s0 = inlined_call_operand.hbm [shape: f32[16,32], index: 0, kind: input, shape index: {}]   ;;  %s848_s1 = inlined_call_operand.hbm [shape: f32[32,64], index: 1, kind: input, shape index: {}]   ;;  %s849_s2 = inlined_call_operand.hbm [shape: f32[1,64], index: 2, kind: input, shape index: {}]   ;;  %s850_s3 = inlined_call_operand.hbm [shape: f32[64,32], index: 3, kind: input, shape index: {}]   ;;  %s851_s4 = inlined_call_operand.hbm [shape: f32[1,32], index: 4, kind: input, shape index: {}]   ;;  %s852_s5 = inlined_call_operand.hbm [shape: f32[1,32], index: 5, kind: input, shape index: {}]   ;;  %s853_s6 = inlined_call_operand.hbm [shape: f32[1,32], index: 6, kind: input, shape index: {}]   ;;  %s854_s7 = inlined_call_operand.hbm [shape: f32[16,32], index: 7, kind: output, shape index: {}]  }
   0x1   :  { %13 = vsyncpa [#allocation6], 0 }
   0x2   :  { %14 = vsyncpa [#allocation9], 0 }
   0x3   :  { %15 = vsyncpa [#allocation12], 0 }
   0x4   :  { %16 = vsyncpa [#allocation4], 0  ;;  %s667_s24 = smov [#allocation5]   ;;  %s668_s26 = smov [#allocation8]  }
   0x5   :  { %s34_s25 = sshll.u32 %s667_s24, 4  ;;  %s56_s27 = sshll.u32 %s668_s26, 4  ;;  %s35_s25 = int_to_ptr.vmem [resolvable:$true] %s34_s25  ;;  %s717_s27 = int_to_ptr.vmem [resolvable:$true] %s56_s27 }
   0x6   :  { %s481_s30 = scalar_lea.hbm %s848_s1, 512 }
   0x7   :  { %p482_p0 = scmp.ne.s32.totalorder %s848_s1, %s481_s30  ;;  %p485_p1 = scmp.lt.u32.totalorder %s481_s30, %s848_s1 }
   0x9   :  { %p487_p2 = pnand %p485_p1, %p482_p0 }
   0xb   :  { %490 = shalt.err (!%p487_p2)
}
   0xc   :  { %s491_s12 = scalar_lea.vmem %s35_s25, 512  ;;  %p496_p4 = scmp.lt.s32.totalorder %s35_s25, %s35_s25 }
   0xd   :  { %p492_p3 = scmp.ne.s32.totalorder %s35_s25, %s491_s12  ;;  %p497_p5 = scmp.lt.s32.totalorder %s491_s12, %s491_s12 }
   0xf   :  { %p498_p6 = por %p497_p5, %p496_p4 }
  0x11   :  { %p499_p7 = pnand %p498_p6, %p492_p3 }
  0x13   :  { %502 = shalt.err (!%p499_p7)
}
  0x14   :  { %s669_s13 = smov 128   ;;  %s670_s14 = smov 8  }
  0x15   :  { %40 = dma.hbm_to_vmem [thread:$0]  %s848_s1, 512, %s35_s25, [#allocation6], %s669_s13, %s669_s13, %s670_s14  }
  0x16   :  { %s503_s19 = scalar_lea.hbm %s850_s3, 1024 }
  0x17   :  { %p504_p8 = scmp.ne.s32.totalorder %s850_s3, %s503_s19  ;;  %p507_p9 = scmp.lt.u32.totalorder %s503_s19, %s850_s3 }
  0x19   :  { %p509_p10 = pnand %p507_p9, %p504_p8 }
  0x1b   :  { %512 = shalt.err (!%p509_p10)
}
  0x1c   :  { %s513_s24 = scalar_lea.vmem %s717_s27, 1024  ;;  %p518_p12 = scmp.lt.s32.totalorder %s717_s27, %s717_s27 }
  0x1d   :  { %p514_p11 = scmp.ne.s32.totalorder %s717_s27, %s513_s24  ;;  %p519_p13 = scmp.lt.s32.totalorder %s513_s24, %s513_s24 }
  0x1f   :  { %p520_p0 = por %p519_p13, %p518_p12 }
  0x21   :  { %p521_p1 = pnand %p520_p0, %p514_p11 }
  0x23   :  { %524 = shalt.err (!%p521_p1)
}
  0x24   :  { %62 = dma.hbm_to_vmem [thread:$0]  %s850_s3, 1024, %s717_s27, [#allocation9], %s669_s13, %s669_s13, %s670_s14  }
  0x25   :  { %s671_s26 = smov [#allocation11]   ;;  %s672_s29 = smov [#allocation2]  }
  0x26   :  { %s79_s28 = sshll.u32 %s671_s26, 4  ;;  %s22_s30 = sshll.u32 %s672_s29, 4  ;;  %s80_s28 = int_to_ptr.vmem [resolvable:$true] %s79_s28  ;;  %s754_s30 = int_to_ptr.vmem [resolvable:$true] %s22_s30 }
  0x27   :  { %s525_s10 = scalar_lea.hbm %s852_s5, 16 }
  0x28   :  { %p526_p2 = scmp.ne.s32.totalorder %s852_s5, %s525_s10  ;;  %p529_p3 = scmp.lt.u32.totalorder %s525_s10, %s852_s5 }
  0x2a   :  { %p531_p4 = pnand %p529_p3, %p526_p2 }
  0x2c   :  { %534 = shalt.err (!%p531_p4)
}
  0x2d   :  { %s535_s3 = scalar_lea.vmem %s80_s28, 16  ;;  %s539_s27 = scalar_lea.vmem %s80_s28, 32 }
  0x2e   :  { %p536_p5 = scmp.ne.s32.totalorder %s80_s28, %s535_s3  ;;  %p540_p6 = scmp.lt.s32.totalorder %s80_s28, %s80_s28 }
  0x2f   :  { %p541_p7 = scmp.lt.s32.totalorder %s539_s27, %s535_s3 }
  0x31   :  { %p542_p8 = por %p541_p7, %p540_p6 }
  0x33   :  { %p543_p9 = pnand %p542_p8, %p536_p5 }
  0x35   :  { %546 = shalt.err (!%p543_p9)
}
  0x36   :  { %82 = dma.hbm_to_vmem [thread:$0]  %s852_s5, 16, %s80_s28, [#allocation12]  }
  0x37   :  { %s547_s21 = scalar_lea.hbm %s847_s0, 256 }
  0x38   :  { %p548_p10 = scmp.ne.s32.totalorder %s847_s0, %s547_s21  ;;  %p551_p11 = scmp.lt.u32.totalorder %s547_s21, %s847_s0 }
  0x3a   :  { %p553_p12 = pnand %p551_p11, %p548_p10 }
  0x3c   :  { %556 = shalt.err (!%p553_p12)
}
  0x3d   :  { %s557_s25 = scalar_lea.vmem %s754_s30, 256  ;;  %p562_p0 = scmp.lt.s32.totalorder %s754_s30, %s754_s30 }
  0x3e   :  { %p558_p13 = scmp.ne.s32.totalorder %s754_s30, %s557_s25  ;;  %p563_p1 = scmp.lt.s32.totalorder %s557_s25, %s557_s25 }
  0x40   :  { %p564_p2 = por %p563_p1, %p562_p0 }
  0x42   :  { %p565_p3 = pnand %p564_p2, %p558_p13 }
  0x44   :  { %568 = shalt.err (!%p565_p3)
}
  0x45   :  { %28 = dma.hbm_to_vmem [thread:$0]  %s847_s0, 256, %s754_s30, [#allocation3], %s669_s13, %s669_s13, %s670_s14  }
  0x46   :  { %s673_s28 = smov [#allocation7]   ;;  %s674_s8 = smov [#allocation10]  }
  0x47   :  { %s47_s29 = sshll.u32 %s673_s28, 4  ;;  %s69_s9 = sshll.u32 %s674_s8, 4  ;;  %s48_s29 = int_to_ptr.vmem [resolvable:$true] %s47_s29  ;;  %s70_s9 = int_to_ptr.vmem [resolvable:$true] %s69_s9 }
  0x48   :  { %s569_s12 = scalar_lea.hbm %s849_s2, 16 }
  0x49   :  { %p570_p4 = scmp.ne.s32.totalorder %s849_s2, %s569_s12  ;;  %p573_p5 = scmp.lt.u32.totalorder %s569_s12, %s849_s2 }
  0x4b   :  { %p575_p6 = pnand %p573_p5, %p570_p4 }
  0x4d   :  { %578 = shalt.err (!%p575_p6)
}
  0x4e   :  { %s579_s0 = scalar_lea.vmem %s48_s29, 16  ;;  %s583_s30 = scalar_lea.vmem %s48_s29, 32 }
  0x4f   :  { %p580_p7 = scmp.ne.s32.totalorder %s48_s29, %s579_s0  ;;  %p584_p8 = scmp.lt.s32.totalorder %s48_s29, %s48_s29 }
  0x50   :  { %p585_p9 = scmp.lt.s32.totalorder %s583_s30, %s579_s0 }
  0x52   :  { %p586_p10 = por %p585_p9, %p584_p8 }
  0x54   :  { %p587_p11 = pnand %p586_p10, %p580_p7 }
  0x56   :  { %590 = shalt.err (!%p587_p11)
}
  0x57   :  { %50 = dma.hbm_to_vmem [thread:$0]  %s849_s2, 16, %s48_s29, [#allocation6]  }
  0x58   :  { %s591_s21 = scalar_lea.hbm %s851_s4, 16 }
  0x59   :  { %p592_p12 = scmp.ne.s32.totalorder %s851_s4, %s591_s21  ;;  %p595_p13 = scmp.lt.u32.totalorder %s591_s21, %s851_s4 }
  0x5b   :  { %p597_p0 = pnand %p595_p13, %p592_p12 }
  0x5d   :  { %600 = shalt.err (!%p597_p0)
}
  0x5e   :  { %s601_s25 = scalar_lea.vmem %s70_s9, 16  ;;  %s605_s5 = scalar_lea.vmem %s70_s9, 32 }
  0x5f   :  { %p602_p1 = scmp.ne.s32.totalorder %s70_s9, %s601_s25  ;;  %p606_p2 = scmp.lt.s32.totalorder %s70_s9, %s70_s9 }
  0x60   :  { %p607_p3 = scmp.lt.s32.totalorder %s605_s5, %s601_s25 }
  0x62   :  { %p608_p4 = por %p607_p3, %p606_p2 }
  0x64   :  { %p609_p5 = pnand %p608_p4, %p602_p1 }
  0x66   :  { %612 = shalt.err (!%p609_p5)
}
  0x67   :  { %72 = dma.hbm_to_vmem [thread:$0]  %s851_s4, 16, %s70_s9, [#allocation9]  }
  0x68   :  { %s675_s28 = smov [#allocation13]   ;;  %s613_s11 = scalar_lea.hbm %s853_s6, 16 }
  0x69   :  { %s89_s29 = sshll.u32 %s675_s28, 4  ;;  %p614_p6 = scmp.ne.s32.totalorder %s853_s6, %s613_s11  ;;  %s90_s29 = int_to_ptr.vmem [resolvable:$true] %s89_s29 }
  0x6a   :  { %p617_p7 = scmp.lt.u32.totalorder %s613_s11, %s853_s6 }
  0x6c   :  { %p619_p8 = pnand %p617_p7, %p614_p6 }
  0x6e   :  { %622 = shalt.err (!%p619_p8)
}
  0x6f   :  { %s623_s27 = scalar_lea.vmem %s90_s29, 16  ;;  %s627_s4 = scalar_lea.vmem %s90_s29, 32 }
  0x70   :  { %p624_p9 = scmp.ne.s32.totalorder %s90_s29, %s623_s27  ;;  %p628_p10 = scmp.lt.s32.totalorder %s90_s29, %s90_s29 }
  0x71   :  { %p629_p11 = scmp.lt.s32.totalorder %s627_s4, %s623_s27 }
  0x73   :  { %p630_p12 = por %p629_p11, %p628_p10 }
  0x75   :  { %p631_p13 = pnand %p630_p12, %p624_p9 }
  0x77   :  { %634 = shalt.err (!%p631_p13)
}
  0x78   :  { %92 = dma.hbm_to_vmem [thread:$0]  %s853_s6, 16, %s90_s29, [#allocation12]  }
  0x79   :  { %657 = dma.done.wait [#allocation3], 256  }
  0x7a   :  { %658 = vsyncadd [#allocation3], 4294967040 }
  0x7b   :  { %659 = dma.done.wait [#allocation6], 528  }
  0x7c   :  { %660 = vsyncadd [#allocation6], 4294966768 }
  0x7d   :  { %661 = dma.done.wait [#allocation9], 1040  }
  0x7e   :  { %662 = vsyncadd [#allocation9], 4294966256 }
  0x7f   :  { %663 = dma.done.wait [#allocation12], 32  }
  0x80   :  { %664 = vsyncadd [#allocation12], 4294967264  ;;  %vm127_vm0 = vcmask 261120   ;;  %v116_v0 = vld [vmem:[#allocation5] sm:$0xff]  ;;  %v117_v1 = vld [vmem:[#allocation5 + $0x8] sm:$0xff]  ;;  %vm234_vm1 = vcmask 523264  }
  0x81   :  { %v118_v2 = vld [vmem:[#allocation5 + $0x10] sm:$0xff]  ;;  %v439_v3 = vpack.c.bf16 %v117_v1, %v116_v0  ;;  %v119_v4 = vld [vmem:[#allocation5 + $0x18] sm:$0xff]  ;;  %v219_v8 = vld [vmem:[#allocation8] sm:$0xff]  ;;  %s676_s6 = smov [#allocation14]  }
  0x82   :  { %v114_v5 = vld [vmem:[#allocation2] sm:$0xff]  ;;  %v443_v6 = vpack.c.bf16 %v119_v4, %v118_v2  ;;  %v115_v7 = vld [vmem:[#allocation2 + $0x8] sm:$0xff]  ;;  %v223_v14 = vld [vmem:[#allocation8 + $0x20] sm:$0xff]  ;;  %s370_s30 = sshll.u32 %s676_s6, 4  ;;  %s371_s30 = int_to_ptr.vmem [resolvable:$true] %s370_s30 }
  0x83   :  { %417 = vmatprep.mubr.msk.f32.mxu0 %vm127_vm0, %v114_v5  ;;  %440 = vmatprep.subr.bf16.mxu0 %v439_v3  ;;  %v220_v9 = vld [vmem:[#allocation8 + $0x8] sm:$0xff]  ;;  %v221_v11 = vld [vmem:[#allocation8 + $0x10] sm:$0xff]  ;;  %v222_v12 = vld [vmem:[#allocation8 + $0x18] sm:$0xff]  ;;  %s635_s17 = scalar_lea.vmem %s371_s30, 256  ;;  %p640_p1 = scmp.lt.s32.totalorder %s371_s30, %s371_s30 }
  0x84   :  { %442 = vmatpush3.bf16.msra.mxu0 %v439_v3  ;;  %v447_v10 = vpack.c.bf16 %v220_v9, %v219_v8  ;;  %v451_v13 = vpack.c.bf16 %v222_v12, %v221_v11  ;;  %v224_v15 = vld [vmem:[#allocation8 + $0x28] sm:$0xff]  ;;  %v225_v17 = vld [vmem:[#allocation8 + $0x30] sm:$0xff]  ;;  %v226_v18 = vld [vmem:[#allocation8 + $0x38] sm:$0xff]  ;;  %p636_p0 = scmp.ne.s32.totalorder %s371_s30, %s635_s17  ;;  %p641_p2 = scmp.lt.s32.totalorder %s635_s17, %s635_s17 }
  0x85   :  { %444 = vmatprep.subr.bf16.mxu0 %v443_v6  ;;  %v455_v16 = vpack.c.bf16 %v224_v15, %v223_v14  ;;  %v459_v19 = vpack.c.bf16 %v226_v18, %v225_v17  ;;  %v385_v20 = vld [vmem:[#allocation7] ss:$0 sm:$0xff]  ;;  %v388_v35 = vld [vmem:[#allocation10] ss:$0 sm:$0xff]  ;;  %v391_v61 = vld [vmem:[#allocation11] ss:$0 sm:$0xff] }
  0x86   :  { %448 = vmatprep.subr.bf16.mxu1 %v447_v10  ;;  %v392_v63 = vld [vmem:[#allocation13] ss:$0 sm:$0xff]  ;;  %p642_p3 = por %p641_p2, %p640_p1 }
  0x87   :  { %450 = vmatpush3.bf16.msra.mxu1 %v447_v10 }
  0x88   :  { %446 = vmatpush3.bf16.msra.mxu0 %v443_v6  ;;  %452 = vmatprep.subr.bf16.mxu1 %v451_v13  ;;  %p643_p4 = pnand %p642_p3, %p636_p0 }
  0x8b   :  { %418 = vmatmul.mubr.msk.f32.vlgmr.msra.gmra.mrb[0].mxu0 %vm127_vm0, %v115_v7  ;;  %454 = vmatpush3.bf16.msra.mxu1 %v451_v13 }
  0x8c   :  { %456 = vmatprep.subr.bf16.mxu1 %v455_v16 }
  0x8f   :  { %458 = vmatpush3.bf16.msra.mxu1 %v455_v16 }
  0x90   :  { %460 = vmatprep.subr.bf16.mxu1 %v459_v19 }
  0x93   :  { %462 = vmatpush3.bf16.msra.mxu1 %v459_v19 }
 0x15e   :  { %v419_v21 = vpop.f32.mrb[0].mxu0 }
 0x15f   :  { %v206_v22 = vadd.f32 %v419_v21, %v385_v20  ;;  %v200_v23 = vpop.f32.mrb[1].mxu0 }
 0x160   :  { %v201_v24 = vadd.f32 %v385_v20, %v200_v23 }
 0x161   :  { %v212_v25 = vmul.f32 0.70710677, %v206_v22  ;;  %v210_v32 = vmul.f32 0.5, %v206_v22 }
 0x162   :  { %v211_v26 = vmul.f32 0.70710677, %v201_v24  ;;  %v209_v30 = vmul.f32 0.5, %v201_v24 }
 0x163   :  { %473 = verf.f32 %v212_v25 }
 0x164   :  { %475 = verf.f32 %v211_v26 }
 0x16d   :  { %v474_v27 = vpop.eup %473 }
 0x16e   :  { %v476_v28 = vpop.eup %475  ;;  %v216_v29 = vadd.f32 1.0, %v474_v27 }
 0x16f   :  { %v215_v31 = vadd.f32 1.0, %v476_v28 }
 0x170   :  { %v218_v34 = vmul.f32 %v216_v29, %v210_v32 }
 0x171   :  { %v217_v33 = vmul.f32 %v215_v31, %v209_v30 }
 0x173   :  { %436 = vmatprep.mubr.msk.f32.mxu1 %vm234_vm1, %v217_v33 }
 0x174   :  { %437 = vmatmul.mubr.msk.f32.vlgmr.msra.gmra.mrb[0].mxu1 %vm234_vm1, %v218_v34 }
 0x247   :  { %v438_v36 = vpop.f32.mrb[0].mxu1 }
 0x248   :  { %v307_v37 = vpop.f32.mrb[1].mxu1  ;;  %v313_v38 = vadd.f32 %v438_v36, %v388_v35 }
 0x249   :  { %v308_v39 = vadd.f32 %v388_v35, %v307_v37 }
 0x24a   :  { %v317_v42 = vadd.f32 %v313_v38, %v115_v7 }
 0x24b   :  { %v316_v40 = vadd.f32 %v308_v39, %v114_v5 }
 0x24c   :  { %v321_v43 = vsel %vm127_vm0, %v317_v42, 0.0 }
 0x24d   :  { %v318_v41 = vsel %vm127_vm0, %v316_v40, 0.0 }
 0x24e   :  { %319 = vadd.xlane.f32.xlu0 %v318_v41 }
 0x252   :  { %322 = vadd.xlane.f32.xlu0 %v321_v43 }
 0x2db   :  { %v320_v44 = vpop.xlane.xlu0 %319 }
 0x2dc   :  { %v325_v45 = vmul.f32 0.03125, %v320_v44 }
 0x2de   :  { %v327_v46 = vsub.f32 %v316_v40, %v325_v45 }
 0x2df   :  { %v323_v47 = vpop.xlane.xlu0 %322 }
 0x2e0   :  { %v326_v48 = vmul.f32 0.03125, %v323_v47  ;;  %v329_v49 = vmul.f32 %v327_v46, %v327_v46 }
 0x2e2   :  { %v328_v50 = vsub.f32 %v317_v42, %v326_v48  ;;  %v331_v51 = vsel %vm127_vm0, %v329_v49, 0.0 }
 0x2e3   :  { %332 = vadd.xlane.f32.xlu1 %v331_v51 }
 0x2e4   :  { %v330_v52 = vmul.f32 %v328_v50, %v328_v50 }
 0x2e6   :  { %v334_v53 = vsel %vm127_vm0, %v330_v52, 0.0 }
 0x2e7   :  { %335 = vadd.xlane.f32.xlu1 %v334_v53 }
 0x370   :  { %v333_v54 = vpop.xlane.xlu1 %332 }
 0x371   :  { %v337_v55 = vmul.f32 0.03125, %v333_v54 }
 0x373   :  { %v339_v56 = vadd.f32 1e-12, %v337_v55 }
 0x374   :  { %v336_v57 = vpop.xlane.xlu1 %335 }
 0x375   :  { %477 = vrsqrt.f32 %v339_v56  ;;  %v338_v58 = vmul.f32 0.03125, %v336_v57 }
 0x377   :  { %v340_v59 = vadd.f32 1e-12, %v338_v58 }
 0x379   :  { %479 = vrsqrt.f32 %v340_v59 }
 0x37f   :  { %v478_v60 = vpop.eup %477 }
 0x380   :  { %v343_v62 = vmul.f32 %v478_v60, %v327_v46 }
 0x382   :  { %v352_v0 = vmul.f32 %v391_v61, %v343_v62 }
 0x383   :  { %v480_v1 = vpop.eup %479 }
 0x384   :  { %v344_v2 = vmul.f32 %v480_v1, %v328_v50  ;;  %v361_v3 = vadd.f32 %v392_v63, %v352_v0 }
 0x386   :  { %v353_v4 = vmul.f32 %v391_v61, %v344_v2  ;;  %363 = vst.msk [vmem:[#allocation14] sm:$0xff] %vm127_vm0, %v361_v3 }
 0x388   :  { %v362_v5 = vadd.f32 %v392_v63, %v353_v4 }
 0x38a   :  { %364 = vst.msk [vmem:[#allocation14 + $0x8] sm:$0xff] %vm127_vm0, %v362_v5 }
 0x38b   :  { %646 = shalt.err (!%p643_p4)
}
 0x38c   :  { %s647_s20 = scalar_lea.hbm %s854_s7, 256 }
 0x38d   :  { %p648_p5 = scmp.ne.s32.totalorder %s854_s7, %s647_s20  ;;  %p651_p6 = scmp.lt.u32.totalorder %s647_s20, %s854_s7 }
 0x38f   :  { %p653_p7 = pnand %p651_p6, %p648_p5 }
 0x391   :  { %656 = shalt.err (!%p653_p7)
}
 0x392   :  { %376 = dma.vmem_to_hbm [thread:$0]  %s371_s30, 256, %s854_s7, [#allocation4], %s669_s13, %s669_s13, %s670_s14  }
 0x393   :  { %665 = dma.done.wait [#allocation4], 256  }
 0x394   :  { %666 = vsyncadd [#allocation4], 4294967040 }
 0x395   :  { %380 = vsyncpa [#allocation3], 1 }
 0x396   :  { %381 = vsyncpa [#allocation6], 1 }
 0x397   :  { %382 = vsyncpa [#allocation9], 1 }
 0x398   :  { %383 = vsyncpa [#allocation12], 1 }
 0x399   :  { %384 = vsyncpa [#allocation4], 1 }

</bundles_post_ra>
